<compile_context>
chip_gen: v7x
topology: tpu7x:2x2x1
jax: 0.10.0
libtpu: 0.0.40
codegen_flags: <defaults>
</compile_context>

<pallas_src>
import functools

import jax
import jax.numpy as jnp
from jax.experimental import pallas as pl
from jax.experimental.pallas import tpu as pltpu


# Below this total HBM traffic, run everything in a single invocation (no grid).
_SMALL_BYTES = 2 << 20


def _cdiv(a, b):
    return -(-a // b)


def _hw_params():
    """Generation-aware tuning: block-size target, VMEM cap, 2-TC balancing."""
    kind = ""
    try:
        kind = jax.devices()[0].device_kind.lower()
    except Exception:
        pass
    is_v7x = ("v7" in kind) or ("7x" in kind)
    if is_v7x:
        # 64 MiB VMEM / ~3.2 TB/s HBM: bigger blocks amortize the fixed
        # per-step cost; triple-buffer the input; balance the two TensorCores.
        return dict(target_bytes=12 << 20, vmem_cap=48 << 20,
                    two_cores=True, in_buffers=3)
    # v5e / v6e (and unknown chips): ~8 MiB blocks already sit on the measured
    # roofline plateau; plain double buffering is enough.
    return dict(target_bytes=8 << 20, vmem_cap=64 << 20,
                two_cores=False, in_buffers=2)


def _choose_seq_tile(L, S, D, itemsize, target_bytes):
    """Pick sequence-tile rows so the x block is ~target_bytes."""
    row_bytes = max(1, L * D * itemsize)
    cap_rows = max(1, target_bytes // row_bytes)
    if cap_rows >= S:
        return S  # full extent is always a legal block shape
    # sublane packing: 8 rows for 4-byte dtypes, 16 for 2-byte, 32 for 1-byte
    align = {4: 8, 2: 16, 1: 32}.get(itemsize, 8)
    t = max(align, (cap_rows // align) * align)  # masked-boundary fallback
    # Prefer an exact divisor of S (no masked tail store), but never accept a
    # degenerate one: below ~half the target tile (or below 128 rows) the
    # per-step overhead dominates and HBM utilization collapses.
    floor = max(align, t // 2)
    if t >= 128:
        floor = max(floor, 128)
    probe = t
    while probe >= floor:
        if S % probe == 0:
            return probe
        probe -= align
    return t  # no good divisor: keep the big tile, Pallas masks the tail block


def _balance_two_cores(B, S, ts, align):
    """v7x: make the total grid-step count even so both TCs get equal work."""
    n_s = _cdiv(S, ts)
    if (B * n_s) % 2 == 0:
        return ts
    floor = max(align, ts // 2)
    # Candidate tiles must stay sublane-aligned (or equal the full extent).
    probe = (ts // align) * align
    if probe == ts:
        probe -= align
    while probe >= floor:
        if (B * _cdiv(S, probe)) % 2 == 0:
            return probe
        probe -= align
    return ts


def _combiner_kernel_whole(w_ref, x_ref, o_ref, *, num_layers):
    # w_ref: SMEM (L,) f32;  x_ref: VMEM (B, L, S, D);  o_ref: VMEM (B, S, D)
    # Read per-layer from the ref: no full-size upcast copy is materialized.
    acc = w_ref[0] * x_ref[:, 0].astype(jnp.float32)
    for l in range(1, num_layers):  # L is tiny (e.g. 3) -> fully unrolled
        acc = acc + w_ref[l] * x_ref[:, l].astype(jnp.float32)
    o_ref[...] = acc.astype(o_ref.dtype)


def _combiner_kernel_tiled(w_ref, x_ref, o_ref, *, num_layers):
    # w_ref: SMEM (L,) f32;  x_ref: VMEM (L, ts, D);  o_ref: VMEM (ts, D)
    # Accumulator initialized with the first layer (saves a zero + add).
    acc = w_ref[0] * x_ref[0].astype(jnp.float32)
    for l in range(1, num_layers):  # fully unrolled VPU multiply-adds
        acc = acc + w_ref[l] * x_ref[l].astype(jnp.float32)
    o_ref[...] = acc.astype(o_ref.dtype)


def elmo_combiner(x, w):
    """x: (B, L, S, D), w: (L,) -> (B, S, D) = sum_l w[l] * x[:, l]."""
    B, L, S, D = x.shape
    assert w.shape == (L,)
    w = w.astype(jnp.float32)  # weights are read as 32-bit scalars from SMEM

    itemsize = jnp.dtype(x.dtype).itemsize
    out_shape = jax.ShapeDtypeStruct((B, S, D), x.dtype)
    cost = pl.CostEstimate(
        flops=2 * B * L * S * D,
        transcendentals=0,
        bytes_accessed=(L + 1) * B * S * D * itemsize + L * 4,
    )

    total_bytes = (L + 1) * B * S * D * itemsize
    if total_bytes <= _SMALL_BYTES:
        # Tiny input (e.g. the unit test): one invocation, no grid.
        kernel = functools.partial(_combiner_kernel_whole, num_layers=L)
        return pl.pallas_call(
            kernel,
            out_shape=out_shape,
            in_specs=[
                pl.BlockSpec(memory_space=pltpu.MemorySpace.SMEM),
                pl.BlockSpec(memory_space=pltpu.MemorySpace.VMEM),
            ],
            out_specs=pl.BlockSpec(memory_space=pltpu.MemorySpace.VMEM),
            cost_estimate=cost,
        )(w, x)

    # General path: tile the sequence axis; grid = (B, S_tiles), both parallel.
    hw = _hw_params()
    align = {4: 8, 2: 16, 1: 32}.get(itemsize, 8)
    ts = _choose_seq_tile(L, S, D, itemsize, hw["target_bytes"])
    if hw["two_cores"]:
        ts = _balance_two_cores(B, S, ts, align)
    n_s = _cdiv(S, ts)

    x_blk = L * ts * D * itemsize
    o_blk = ts * D * itemsize
    headroom = 4 << 20
    in_bufs = hw["in_buffers"]
    if in_bufs * x_blk + 2 * o_blk + headroom > hw["vmem_cap"]:
        in_bufs = 2  # drop triple buffering rather than shrink the block
    vmem_limit = int(min(max(in_bufs * x_blk + 2 * o_blk + headroom, 32 << 20),
                         hw["vmem_cap"]))

    x_block = (pl.Squeezed(), L, ts, D)
    x_index = lambda b, s: (b, 0, s, 0)
    if in_bufs > 2:
        try:
            x_spec = pl.BlockSpec(x_block, x_index,
                                  pipeline_mode=pl.Buffered(in_bufs))
        except TypeError:  # BlockSpec without pipeline_mode support
            x_spec = pl.BlockSpec(x_block, x_index)
    else:
        x_spec = pl.BlockSpec(x_block, x_index)

    kernel = functools.partial(_combiner_kernel_tiled, num_layers=L)
    return pl.pallas_call(
        kernel,
        out_shape=out_shape,
        grid=(B, n_s),
        in_specs=[
            # (L,) scale weights: resident in SMEM with a constant block index,
            # so they are fetched once, not re-pipelined per grid step.
            pl.BlockSpec((L,), lambda b, s: (0,),
                         memory_space=pltpu.MemorySpace.SMEM),
            # one (batch, seq-tile) block carrying all L layers
            x_spec,
        ],
        out_specs=pl.BlockSpec((pl.Squeezed(), ts, D),
                               lambda b, s: (b, s, 0)),
        compiler_params=pltpu.CompilerParams(
            dimension_semantics=("parallel", "parallel"),
            vmem_limit_bytes=vmem_limit,
        ),
        cost_estimate=cost,
    )(w, x)


def elmo_combiner_ref(x, w):
    return jnp.sum(x * w[None, :, None, None].astype(x.dtype), axis=1)


if __name__ == "__main__":
    key = jax.random.PRNGKey(0)
    kx, kw, kx2 = jax.random.split(key, 3)

    # Small shapes consistent with the module's forward:
    # (batch=2, input_layer=3, seq=8, emb_dimension=128) -> single-shot path.
    B, L, S, D = 2, 3, 8, 128
    x = jax.random.normal(kx, (B, L, S, D), dtype=jnp.float32)
    w = jax.random.normal(kw, (L,), dtype=jnp.float32)  # torch.randn(input_layer)

    out = elmo_combiner(x, w)
    jax.block_until_ready(out)
    ref = elmo_combiner_ref(x, w)
    assert out.shape == (B, S, D)
    assert jnp.allclose(out, ref, atol=1e-5, rtol=1e-5)

    # Moderate shape (module default emb_dimension=1024) -> tiled grid path.
    B2, L2, S2, D2 = 2, 3, 1024, 1024
    x2 = jax.random.normal(kx2, (B2, L2, S2, D2), dtype=jnp.float32)
    out2 = elmo_combiner(x2, w)
    jax.block_until_ready(out2)
    ref2 = elmo_combiner_ref(x2, w)
    assert out2.shape == (B2, S2, D2)
    assert jnp.allclose(out2, ref2, atol=1e-4, rtol=1e-4)

    print("KERNEL_OK")
</pallas_src>

<mosaic_0001>
module attributes {stable_mosaic.version = 11 : i64} {
  func.func @_combiner_kernel_whole(%arg0: memref<3xf32, #tpu.memory_space<smem>>, %arg1: memref<2x3x8x128xf32, #tpu.memory_space<vmem>>, %arg2: memref<2x8x128xf32, #tpu.memory_space<vmem>>) attributes {dimension_semantics = [], scalar_prefetch = 0 : i64, scratch_operands = 0 : i64, tpu.core_type = #tpu.core_type<tc>} {
    %c0 = arith.constant 0 : index
    %0 = memref.load %arg0[%c0] : memref<3xf32, #tpu.memory_space<smem>>
    %c0_0 = arith.constant 0 : index
    %c0_1 = arith.constant 0 : index
    %c0_2 = arith.constant 0 : index
    %c0_3 = arith.constant 0 : index
    %1 = vector.load %arg1[%c0_0, %c0_1, %c0_2, %c0_3] : memref<2x3x8x128xf32, #tpu.memory_space<vmem>>, vector<2x1x8x128xf32>
    %2 = vector.shape_cast %1 : vector<2x1x8x128xf32> to vector<2x8x128xf32>
    %3 = vector.broadcast %0 : f32 to vector<2x8x128xf32>
    %4 = arith.mulf %3, %2 : vector<2x8x128xf32>
    %c1 = arith.constant 1 : index
    %5 = memref.load %arg0[%c1] : memref<3xf32, #tpu.memory_space<smem>>
    %c0_4 = arith.constant 0 : index
    %c1_5 = arith.constant 1 : index
    %c0_6 = arith.constant 0 : index
    %c0_7 = arith.constant 0 : index
    %6 = vector.load %arg1[%c0_4, %c1_5, %c0_6, %c0_7] : memref<2x3x8x128xf32, #tpu.memory_space<vmem>>, vector<2x1x8x128xf32>
    %7 = vector.shape_cast %6 : vector<2x1x8x128xf32> to vector<2x8x128xf32>
    %8 = vector.broadcast %5 : f32 to vector<2x8x128xf32>
    %9 = arith.mulf %8, %7 : vector<2x8x128xf32>
    %10 = arith.addf %4, %9 : vector<2x8x128xf32>
    %c2 = arith.constant 2 : index
    %11 = memref.load %arg0[%c2] : memref<3xf32, #tpu.memory_space<smem>>
    %c0_8 = arith.constant 0 : index
    %c2_9 = arith.constant 2 : index
    %c0_10 = arith.constant 0 : index
    %c0_11 = arith.constant 0 : index
    %12 = vector.load %arg1[%c0_8, %c2_9, %c0_10, %c0_11] : memref<2x3x8x128xf32, #tpu.memory_space<vmem>>, vector<2x1x8x128xf32>
    %13 = vector.shape_cast %12 : vector<2x1x8x128xf32> to vector<2x8x128xf32>
    %14 = vector.broadcast %11 : f32 to vector<2x8x128xf32>
    %15 = arith.mulf %14, %13 : vector<2x8x128xf32>
    %16 = arith.addf %10, %15 : vector<2x8x128xf32>
    %c0_12 = arith.constant 0 : index
    %c0_13 = arith.constant 0 : index
    %c0_14 = arith.constant 0 : index
    %17 = vector.load %arg2[%c0_12, %c0_13, %c0_14] : memref<2x8x128xf32, #tpu.memory_space<vmem>>, vector<2x8x128xf32>
    tpu.vector_store %arg2[%c0_12, %c0_13, %c0_14], %16 {strides = array<i32>} : memref<2x8x128xf32, #tpu.memory_space<vmem>>, vector<2x8x128xf32>,
    return
  }
}

</mosaic_0001>

<bundles_post_ra>
// kernel: tpu_custom_call.1
= control target key start
LH: loop header
LB: loop body
LE: loop exit
PB: predicated region body
PF: predicated region fallthrough
CT: control target
= control target key end

     0   :  { %7 = vsyncpa [#allocation5], 0  ;;  %s210_s0 = inlined_call_operand.hbm [shape: f32[3], index: 0, kind: input, shape index: {}]   ;;  %s211_s1 = inlined_call_operand.hbm [shape: f32[2,3,8,128], index: 1, kind: input, shape index: {}]   ;;  %s212_s2 = inlined_call_operand.hbm [shape: f32[2,8,128], index: 2, kind: output, shape index: {}]  }
   0x1   :  { %8 = vsyncpa [#allocation3], 0 }
   0x2   :  { %9 = vsyncpa [#allocation4], 0  ;;  %s88_s11 = scalar_lea.hbm %s210_s0, 16 }
   0x3   :  { %p89_p0 = scmp.ne.s32.totalorder %s210_s0, %s88_s11  ;;  %p92_p1 = scmp.lt.u32.totalorder %s88_s11, %s210_s0 }
   0x5   :  { %p94_p2 = pnand %p92_p1, %p89_p0 }
   0x7   :  { %97 = shalt.err (!%p94_p2)
}
   0x8   :  { %s148_s16 = smov [#allocation2]   ;;  %s149_s19 = smov [#allocation6]  }
   0x9   :  { %17 = dma.hbm_to_smem %s210_s0, 16, %s148_s16, [#allocation5]  }
   0xa   :  { %s23_s20 = sshll.u32 %s149_s19, 4  ;;  %s98_s23 = scalar_lea.hbm %s211_s1, 768  ;;  %s24_s20 = int_to_ptr.vmem [resolvable:$true] %s23_s20 }
   0xb   :  { %p99_p3 = scmp.ne.s32.totalorder %s211_s1, %s98_s23  ;;  %p102_p4 = scmp.lt.u32.totalorder %s98_s23, %s211_s1 }
   0xd   :  { %p104_p5 = pnand %p102_p4, %p99_p3 }
   0xf   :  { %107 = shalt.err (!%p104_p5)
}
  0x10   :  { %s108_s28 = scalar_lea.vmem %s24_s20, 768  ;;  %p113_p7 = scmp.lt.s32.totalorder %s24_s20, %s24_s20 }
  0x11   :  { %p109_p6 = scmp.ne.s32.totalorder %s24_s20, %s108_s28  ;;  %p114_p8 = scmp.lt.s32.totalorder %s108_s28, %s108_s28 }
  0x13   :  { %p115_p9 = por %p114_p8, %p113_p7 }
  0x15   :  { %p116_p10 = pnand %p115_p9, %p109_p6 }
  0x17   :  { %119 = shalt.err (!%p116_p10)
}
  0x18   :  { %s150_s0 = smov 128   ;;  %s151_s29 = smov 8  }
  0x19   :  { %29 = dma.hbm_to_vmem [thread:$0]  %s211_s1, 768, %s24_s20, [#allocation3], %s150_s0, %s150_s0, %s151_s29  }
  0x1a   :  { %142 = dma.done.wait [#allocation5], 16  }
  0x1b   :  { %143 = vsyncadd [#allocation5], 4294967280 }
  0x1c   :  { %144 = dma.done.wait [#allocation3], 768  }
  0x1d   :  { %145 = vsyncadd [#allocation3], 4294966528 }
  0x1e   :  { %36 = sfence }
  0x1f   :  { %s37_s4 = sld [smem:[#allocation2]]  ;;  %s81_s5 = sld [smem:[#allocation2 + $0x1]]  ;;  %v38_v0 = vld [vmem:[#allocation6] sm:$0xff]  ;;  %v45_v1 = vld [vmem:[#allocation6 + $0x8] sm:$0xff]  ;;  %v39_v2 = vld [vmem:[#allocation6 + $0x18] sm:$0xff] }
  0x20   :  { %s82_s6 = sld [smem:[#allocation2 + $0x2]]  ;;  %v54_v3 = vld [vmem:[#allocation6 + $0x10] sm:$0xff]  ;;  %v46_v4 = vld [vmem:[#allocation6 + $0x20] sm:$0xff]  ;;  %v55_v5 = vld [vmem:[#allocation6 + $0x28] sm:$0xff]  ;;  %s152_s1 = smov [#allocation7]  }
  0x21   :  { %s68_s7 = sshll.u32 %s152_s1, 4  ;;  %s69_s7 = int_to_ptr.vmem [resolvable:$true] %s68_s7 }
  0x22   :  { %s120_s8 = scalar_lea.vmem %s69_s7, 256  ;;  %p125_p12 = scmp.lt.s32.totalorder %s69_s7, %s69_s7 }
  0x23   :  { %p121_p11 = scmp.ne.s32.totalorder %s69_s7, %s120_s8  ;;  %p126_p13 = scmp.lt.s32.totalorder %s120_s8, %s120_s8 }
  0x25   :  { %v40_v6 = vstv %s37_s4  ;;  %v47_v7 = vstv %s81_s5  ;;  %p127_p0 = por %p126_p13, %p125_p12 }
  0x26   :  { %v41_v8 = vmul.f32 %v40_v6, %v38_v0  ;;  %v48_v9 = vmul.f32 %v47_v7, %v45_v1  ;;  %v56_v10 = vstv %s82_s6  ;;  %v42_v11 = vmul.f32 %v40_v6, %v39_v2 }
  0x27   :  { %v57_v12 = vmul.f32 %v56_v10, %v54_v3  ;;  %v49_v13 = vmul.f32 %v47_v7, %v46_v4  ;;  %v58_v14 = vmul.f32 %v56_v10, %v55_v5  ;;  %p128_p1 = pnand %p127_p0, %p121_p11 }
  0x28   :  { %v50_v15 = vadd.f32 %v48_v9, %v41_v8 }
  0x29   :  { %v51_v16 = vadd.f32 %v49_v13, %v42_v11 }
  0x2a   :  { %v59_v17 = vadd.f32 %v57_v12, %v50_v15 }
  0x2b   :  { %v60_v18 = vadd.f32 %v58_v14, %v51_v16 }
  0x2c   :  { %61 = vst [vmem:[#allocation7] sm:$0xff] %v59_v17 }
  0x2d   :  { %62 = vst [vmem:[#allocation7 + $0x8] sm:$0xff] %v60_v18 }
  0x2e   :  { %131 = shalt.err (!%p128_p1)
}
  0x2f   :  { %s132_s11 = scalar_lea.hbm %s212_s2, 256 }
  0x30   :  { %p133_p2 = scmp.ne.s32.totalorder %s212_s2, %s132_s11  ;;  %p136_p3 = scmp.lt.u32.totalorder %s132_s11, %s212_s2 }
  0x32   :  { %p138_p4 = pnand %p136_p3, %p133_p2 }
  0x34   :  { %141 = shalt.err (!%p138_p4)
}
  0x35   :  { %74 = dma.vmem_to_hbm [thread:$0]  %s69_s7, 256, %s212_s2, [#allocation4], %s150_s0, %s150_s0, %s151_s29  }
  0x36   :  { %146 = dma.done.wait [#allocation4], 256  }
  0x37   :  { %147 = vsyncadd [#allocation4], 4294967040 }
  0x38   :  { %78 = vsyncpa [#allocation3], 1 }
  0x39   :  { %79 = vsyncpa [#allocation4], 1 }
  0x3a   :  { %80 = vsyncpa [#allocation5], 1 }

</bundles_post_ra>
